<compile_context>
chip_gen: v7x
topology: tpu7x:2x2x1
jax: 0.10.0
libtpu: 0.0.40
codegen_flags: <defaults>
</compile_context>

<pallas_src>
import functools

import jax
import jax.numpy as jnp
from jax import lax
from jax.experimental import pallas as pl
from jax.experimental.pallas import tpu as pltpu


def _random_agent_kernel(seed_ref, out_ref, *, n_actions: int):
    shape = out_ref.shape  # (8, n_cols), n_cols % 128 == 0

    # Per-element counter (unique lane/sublane id), mixed with the seed.
    rows = lax.broadcasted_iota(jnp.uint32, shape, 0)
    cols = lax.broadcasted_iota(jnp.uint32, shape, 1)
    idx = rows * jnp.uint32(shape[1]) + cols

    seed = seed_ref[0].astype(jnp.uint32)

    # splitmix32-style avalanche hash (pure VPU integer ops, wraps mod 2^32).
    x = idx * jnp.uint32(0x9E3779B9) + seed
    x = x ^ (x >> jnp.uint32(16))
    x = x * jnp.uint32(0x85EBCA6B)
    x = x ^ (x >> jnp.uint32(13))
    x = x * jnp.uint32(0xC2B2AE35)
    x = x ^ (x >> jnp.uint32(16))

    if n_actions & (n_actions - 1) == 0:
        # Power-of-two fast path: single mask op.
        actions = (x & jnp.uint32(n_actions - 1)).astype(jnp.int32)
    else:
        # 23 random mantissa bits -> float32 in [1, 2) -> [0, 1) -> [0, n).
        mant = x >> jnp.uint32(9)
        fbits = mant | jnp.uint32(0x3F800000)
        u = lax.bitcast_convert_type(fbits, jnp.float32) - jnp.float32(1.0)
        actions = (u * jnp.float32(n_actions)).astype(jnp.int32)

    out_ref[...] = actions


@functools.partial(jax.jit, static_argnames=("n_actions",))
def _random_agent_forward(observations, seed_arr, n_actions):
    n_agents = observations.shape[0]

    # Single lane-dense block: 8 sublanes x (multiple of 128) lanes.
    n_cols = 128 * max(1, pl.cdiv(n_agents, 8 * 128))
    out_shape = jax.ShapeDtypeStruct((8, n_cols), jnp.int32)

    out_tile = pl.pallas_call(
        functools.partial(_random_agent_kernel, n_actions=n_actions),
        out_shape=out_shape,
        in_specs=[pl.BlockSpec(memory_space=pltpu.MemorySpace.SMEM)],
        out_specs=pl.BlockSpec(memory_space=pltpu.MemorySpace.VMEM),
    )(seed_arr)

    # Slice down to the (n_agents,) action vector (fused inside this jit).
    return out_tile.reshape(-1)[:n_agents]


def random_agent_forward(observations, seed: int, n_actions: int = 5):
    """Pallas equivalent of RandomAgent.forward(observations)."""
    seed_arr = jnp.asarray([seed], dtype=jnp.int32)
    return _random_agent_forward(observations, seed_arr, n_actions=n_actions)


if __name__ == "__main__":
    key = jax.random.PRNGKey(0)
    # Small deterministic observations: n_agents=2, obs_dim=16.
    observations = jax.random.normal(key, (2, 16), dtype=jnp.float32)

    n_actions = 5
    actions = random_agent_forward(observations, seed=0, n_actions=n_actions)
    actions = jax.block_until_ready(actions)

    assert actions.shape == (observations.shape[0],)
    assert actions.dtype == jnp.int32
    assert bool(jnp.all(actions >= 0)) and bool(jnp.all(actions < n_actions))

    print("KERNEL_OK")
</pallas_src>

<mosaic_0001>
module attributes {stable_mosaic.version = 11 : i64} {
  func.func @_random_agent_kernel(%arg0: memref<1xi32, #tpu.memory_space<smem>>, %arg1: memref<8x128xi32, #tpu.memory_space<vmem>>) attributes {dimension_semantics = [], scalar_prefetch = 0 : i64, scratch_operands = 0 : i64, tpu.core_type = #tpu.core_type<tc>} {
    %0 = tpu.iota {dimensions = array<i32: 0>} : vector<8x128xi32>
    %1 = tpu.iota {dimensions = array<i32: 1>} : vector<8x128xi32>
    %c128_i32 = arith.constant 128 : i32
    %2 = vector.broadcast %c128_i32 : i32 to vector<8x128xi32>
    %3 = arith.muli %0, %2 : vector<8x128xi32>
    %4 = arith.addi %3, %1 : vector<8x128xi32>
    %c0 = arith.constant 0 : index
    %5 = memref.load %arg0[%c0] : memref<1xi32, #tpu.memory_space<smem>>
    %c-1640531527_i32 = arith.constant -1640531527 : i32
    %6 = vector.broadcast %c-1640531527_i32 : i32 to vector<8x128xi32>
    %7 = arith.muli %4, %6 : vector<8x128xi32>
    %8 = vector.broadcast %5 : i32 to vector<8x128xi32>
    %9 = arith.addi %7, %8 : vector<8x128xi32>
    %c16_i32 = arith.constant 16 : i32
    %10 = vector.broadcast %c16_i32 : i32 to vector<8x128xi32>
    %11 = arith.shrui %9, %10 : vector<8x128xi32>
    %12 = arith.xori %9, %11 : vector<8x128xi32>
    %c-2048144789_i32 = arith.constant -2048144789 : i32
    %13 = vector.broadcast %c-2048144789_i32 : i32 to vector<8x128xi32>
    %14 = arith.muli %12, %13 : vector<8x128xi32>
    %c13_i32 = arith.constant 13 : i32
    %15 = vector.broadcast %c13_i32 : i32 to vector<8x128xi32>
    %16 = arith.shrui %14, %15 : vector<8x128xi32>
    %17 = arith.xori %14, %16 : vector<8x128xi32>
    %c-1028477387_i32 = arith.constant -1028477387 : i32
    %18 = vector.broadcast %c-1028477387_i32 : i32 to vector<8x128xi32>
    %19 = arith.muli %17, %18 : vector<8x128xi32>
    %c16_i32_0 = arith.constant 16 : i32
    %20 = vector.broadcast %c16_i32_0 : i32 to vector<8x128xi32>
    %21 = arith.shrui %19, %20 : vector<8x128xi32>
    %22 = arith.xori %19, %21 : vector<8x128xi32>
    %c9_i32 = arith.constant 9 : i32
    %23 = vector.broadcast %c9_i32 : i32 to vector<8x128xi32>
    %24 = arith.shrui %22, %23 : vector<8x128xi32>
    %c1065353216_i32 = arith.constant 1065353216 : i32
    %25 = vector.broadcast %c1065353216_i32 : i32 to vector<8x128xi32>
    %26 = arith.ori %24, %25 : vector<8x128xi32>
    %27 = tpu.bitcast %26 : vector<8x128xi32> -> vector<8x128xf32>
    %cst = arith.constant 1.000000e+00 : f32
    %28 = vector.broadcast %cst : f32 to vector<8x128xf32>
    %29 = arith.subf %27, %28 : vector<8x128xf32>
    %cst_1 = arith.constant 5.000000e+00 : f32
    %30 = vector.broadcast %cst_1 : f32 to vector<8x128xf32>
    %31 = arith.mulf %29, %30 : vector<8x128xf32>
    %32 = arith.fptosi %31 : vector<8x128xf32> to vector<8x128xi32>
    %c0_2 = arith.constant 0 : index
    %c0_3 = arith.constant 0 : index
    %33 = vector.load %arg1[%c0_2, %c0_3] : memref<8x128xi32, #tpu.memory_space<vmem>>, vector<8x128xi32>
    tpu.vector_store %arg1[%c0_2, %c0_3], %32 {strides = array<i32>} : memref<8x128xi32, #tpu.memory_space<vmem>>, vector<8x128xi32>,
    return
  }
}

</mosaic_0001>

<bundles_post_ra>
// kernel: _random_agent_forward.1
= control target key start
LH: loop header
LB: loop body
LE: loop exit
PB: predicated region body
PF: predicated region fallthrough
CT: control target
= control target key end

     0   :  { %v9_v0 = vlaneseq  ;;  %s57_s0 = inlined_call_operand.<no memory space> [shape: s32[1], index: 0, kind: input, shape index: {}]   ;;  %s58_s1 = inlined_call_operand.vmem [shape: s32[8,128], index: 1, kind: output, shape index: {}]  }
   0x1   :  { %v17_v5 = vstv %s57_s0 }
   0x2   :  { %v10_v1 = vshrl.u32 %v9_v0, 7  ;;  %v12_v2 = vand.u32 127, %v9_v0 }
   0x4   :  { %v13_v3 = vmul.u32 128, %v10_v1 }
   0x6   :  { %v14_v4 = vadd.s32 %v13_v3, %v12_v2 }
   0x8   :  { %v16_v6 = vmul.u32 2654435769, %v14_v4 }
   0xa   :  { %v18_v7 = vadd.s32 %v17_v5, %v16_v6 }
   0xc   :  { %v19_v8 = vshrl.u32 %v18_v7, 16 }
   0xe   :  { %v20_v9 = vxor.u32 %v19_v8, %v18_v7 }
  0x10   :  { %v21_v10 = vmul.u32 2246822507, %v20_v9 }
  0x12   :  { %v22_v11 = vshrl.u32 %v21_v10, 13 }
  0x14   :  { %v23_v12 = vxor.u32 %v22_v11, %v21_v10 }
  0x16   :  { %v24_v13 = vmul.u32 3266489909, %v23_v12 }
  0x18   :  { %v25_v14 = vshrl.u32 %v24_v13, 16 }
  0x1a   :  { %v26_v15 = vxor.u32 %v25_v14, %v24_v13 }
  0x1c   :  { %v27_v16 = vshrl.u32 %v26_v15, 9 }
  0x1e   :  { %v28_v17 = vor.u32 1065353216, %v27_v16 }
  0x20   :  { %v38_v18 = vadd.f32 -1.0, %v28_v17 }
  0x22   :  { %v31_v19 = vmul.f32 5.0, %v38_v18 }
  0x24   :  { %v39_v20 = vtrunc.f32 %v31_v19 }
  0x26   :  { %v40_v21 = vcvt.f32.s32 %v39_v20 }
  0x28   :  { %33 = vst [vmem:[%s58_s1] sm:$0xff] %v40_v21 }

</bundles_post_ra>
